<compile_context>
chip_gen: v7x
topology: tpu7x:2x2x1
jax: 0.10.0
libtpu: 0.0.40
codegen_flags: <defaults>
</compile_context>

<pallas_src>
import jax
import jax.numpy as jnp
from jax import lax
from jax.experimental import pallas as pl
from jax.experimental.pallas import tpu as pltpu


def lstm_kernel(w_ref, x_ref, out_ref):
    """Single-layer LSTM recurrence, hidden_size=1, input_size=1, gates packed.

    w_ref:   SMEM (12,) f32, gate order [i, f, g, o], sigmoid-halving prefolded:
               [0:4]  wx'  = s_k * W_ih_k        (s = [0.5, 0.5, 1.0, 0.5])
               [4:8]  wh'  = s_k * W_hh_k
               [8:12] b'   = s_k * (b_ih_k + b_hh_k)
    x_ref:   VMEM (T, B) f32 (time on sublanes, batch on lanes)
    out_ref: VMEM (T, B) f32 (full hidden-state sequence h_t for every batch
             element; the out[-1] column selection happens in the wrapper)
    """
    T, B = x_ref.shape

    # --- hoisted scalar->vector broadcasts, packed on the sublane axis --------
    def row(idx):
        return jnp.full((1, B), w_ref[idx], jnp.float32)

    wx4 = jnp.concatenate([row(0), row(1), row(2), row(3)], axis=0)    # (4, B)
    wh4 = jnp.concatenate([row(4), row(5), row(6), row(7)], axis=0)    # (4, B)
    b4 = jnp.concatenate([row(8), row(9), row(10), row(11)], axis=0)   # (4, B)

    # --- packed, hoisted gate pre-activations: one mul + one add over the slab
    x = x_ref[...]                                                     # (T, B)
    pre = x[:, None, :] * wx4[None, :, :] + b4[None, :, :]             # (T, 4, B)

    h = jnp.zeros((1, B), jnp.float32)
    c = jnp.zeros((1, B), jnp.float32)

    # --- fully unrolled recurrence: 2 EUP pushes per step, lane-dense stores --
    CHUNK = 8                                    # sublane tile height
    for t0 in range(0, T, CHUNK):
        rows = min(CHUNK, T - t0)
        hs = []
        for r in range(rows):
            t = t0 + r
            z4 = pre[t] + wh4 * h                # (4, B); h broadcasts on sublanes
            t4 = jnp.tanh(z4)                    # ONE packed gate tanh (EUP)
            sig4 = 0.5 * t4 + 0.5                # sigmoid form for i/f/o rows
            i = sig4[0:1, :]
            f = sig4[1:2, :]
            g = t4[2:3, :]                       # g gate uses raw tanh
            o = sig4[3:4, :]
            c = f * c + i * g
            h = o * jnp.tanh(c)                  # second (cell) tanh (EUP)
            hs.append(h)
        out_ref[t0:t0 + rows, :] = jnp.concatenate(hs, axis=0)         # (rows, B)


@jax.jit
def lstm_forward(x, w_ih, w_hh, b_ih, b_hh):
    """x: (B, T) float. Returns prediction = out[-1] of shape (T, 1)."""
    B, T = x.shape

    # Fold sigmoid(z) = 0.5*tanh(0.5*z) + 0.5 halving into the i/f/o gate
    # parameters so the kernel's packed tanh needs no per-gate scaling inside.
    s = jnp.array([0.5, 0.5, 1.0, 0.5], jnp.float32)                   # [i,f,g,o]
    wx = w_ih.reshape(4).astype(jnp.float32) * s
    wh = w_hh.reshape(4).astype(jnp.float32) * s
    bb = (b_ih.reshape(4) + b_hh.reshape(4)).astype(jnp.float32) * s
    w_packed = jnp.concatenate([wx, wh, bb])                           # (12,)

    # Time-major layout: time on sublanes (static row slices in the recurrence),
    # batch on lanes.  At (2, 8) this transpose is 64 bytes; for large shapes
    # keep data time-major upstream or transpose once in VMEM instead.
    x_tb = jnp.transpose(x.astype(jnp.float32))                        # (T, B)

    out_tb = pl.pallas_call(
        lstm_kernel,
        out_shape=jax.ShapeDtypeStruct((T, B), jnp.float32),
        in_specs=[
            pl.BlockSpec(memory_space=pltpu.MemorySpace.SMEM),
            pl.BlockSpec(memory_space=pltpu.MemorySpace.VMEM),
        ],
        out_specs=pl.BlockSpec(memory_space=pltpu.MemorySpace.VMEM),
    )(w_packed, x_tb)                                                  # (T, B)

    # out[-1] with batch_first=True == last batch element's full sequence.
    return out_tb[:, B - 1:B]                                          # (T, 1)


def lstm_reference(x, w_ih, w_hh, b_ih, b_hh):
    """Pure-JAX reference with PyTorch nn.LSTM gate ordering [i, f, g, o]."""
    B, T = x.shape
    xr = x.reshape(B, T, 1).astype(jnp.float32)

    def step(carry, x_t):
        h, c = carry                                            # (B, 1)
        gates = x_t @ w_ih.T + h @ w_hh.T + b_ih + b_hh         # (B, 4)
        i = jax.nn.sigmoid(gates[:, 0:1])
        f = jax.nn.sigmoid(gates[:, 1:2])
        g = jnp.tanh(gates[:, 2:3])
        o = jax.nn.sigmoid(gates[:, 3:4])
        c = f * c + i * g
        h = o * jnp.tanh(c)
        return (h, c), h

    init = (jnp.zeros((B, 1), jnp.float32), jnp.zeros((B, 1), jnp.float32))
    _, hs = lax.scan(step, init, jnp.swapaxes(xr, 0, 1))        # (T, B, 1)
    out = jnp.swapaxes(hs, 0, 1)                                # (B, T, 1)
    return out[-1]                                              # (T, 1)


if __name__ == "__main__":
    key = jax.random.PRNGKey(0)
    k_x, k_wih, k_whh, k_bih, k_bhh = jax.random.split(key, 5)

    B, T = 2, 8  # module input: (batch, seq); the feature dim of 1 is added inside
    x = jax.random.normal(k_x, (B, T), dtype=jnp.float32)

    # nn.LSTM(input_size=1, hidden_size=1) parameter shapes, deterministic init
    # (uniform in [-1, 1] = [-1/sqrt(hidden), 1/sqrt(hidden)] for hidden=1).
    w_ih = jax.random.uniform(k_wih, (4, 1), jnp.float32, -1.0, 1.0)  # weight_ih_l0
    w_hh = jax.random.uniform(k_whh, (4, 1), jnp.float32, -1.0, 1.0)  # weight_hh_l0
    b_ih = jax.random.uniform(k_bih, (4,), jnp.float32, -1.0, 1.0)    # bias_ih_l0
    b_hh = jax.random.uniform(k_bhh, (4,), jnp.float32, -1.0, 1.0)    # bias_hh_l0

    pred = lstm_forward(x, w_ih, w_hh, b_ih, b_hh)
    pred = jax.block_until_ready(pred)

    ref = jax.block_until_ready(lstm_reference(x, w_ih, w_hh, b_ih, b_hh))
    assert pred.shape == (T, 1), pred.shape
    assert jnp.allclose(pred, ref, atol=1e-5, rtol=1e-5), (pred, ref)

    print("KERNEL_OK")
</pallas_src>

<mosaic_0001>
module attributes {stable_mosaic.version = 11 : i64} {
  func.func @lstm_kernel(%arg0: memref<12xf32, #tpu.memory_space<smem>>, %arg1: memref<8x2xf32, #tpu.memory_space<vmem>>, %arg2: memref<8x2xf32, #tpu.memory_space<vmem>>) attributes {dimension_semantics = [], scalar_prefetch = 0 : i64, scratch_operands = 0 : i64, tpu.core_type = #tpu.core_type<tc>} {
    %c0 = arith.constant 0 : index
    %0 = memref.load %arg0[%c0] : memref<12xf32, #tpu.memory_space<smem>>
    %1 = vector.broadcast %0 : f32 to vector<1x2xf32>
    %c1 = arith.constant 1 : index
    %2 = memref.load %arg0[%c1] : memref<12xf32, #tpu.memory_space<smem>>
    %3 = vector.broadcast %2 : f32 to vector<1x2xf32>
    %c2 = arith.constant 2 : index
    %4 = memref.load %arg0[%c2] : memref<12xf32, #tpu.memory_space<smem>>
    %5 = vector.broadcast %4 : f32 to vector<1x2xf32>
    %c3 = arith.constant 3 : index
    %6 = memref.load %arg0[%c3] : memref<12xf32, #tpu.memory_space<smem>>
    %7 = vector.broadcast %6 : f32 to vector<1x2xf32>
    %8 = tpu.concatenate %1, %3, %5, %7 in 0 : vector<1x2xf32>, vector<1x2xf32>, vector<1x2xf32>, vector<1x2xf32> -> vector<4x2xf32>
    %c4 = arith.constant 4 : index
    %9 = memref.load %arg0[%c4] : memref<12xf32, #tpu.memory_space<smem>>
    %10 = vector.broadcast %9 : f32 to vector<1x2xf32>
    %c5 = arith.constant 5 : index
    %11 = memref.load %arg0[%c5] : memref<12xf32, #tpu.memory_space<smem>>
    %12 = vector.broadcast %11 : f32 to vector<1x2xf32>
    %c6 = arith.constant 6 : index
    %13 = memref.load %arg0[%c6] : memref<12xf32, #tpu.memory_space<smem>>
    %14 = vector.broadcast %13 : f32 to vector<1x2xf32>
    %c7 = arith.constant 7 : index
    %15 = memref.load %arg0[%c7] : memref<12xf32, #tpu.memory_space<smem>>
    %16 = vector.broadcast %15 : f32 to vector<1x2xf32>
    %17 = tpu.concatenate %10, %12, %14, %16 in 0 : vector<1x2xf32>, vector<1x2xf32>, vector<1x2xf32>, vector<1x2xf32> -> vector<4x2xf32>
    %c8 = arith.constant 8 : index
    %18 = memref.load %arg0[%c8] : memref<12xf32, #tpu.memory_space<smem>>
    %19 = vector.broadcast %18 : f32 to vector<1x2xf32>
    %c9 = arith.constant 9 : index
    %20 = memref.load %arg0[%c9] : memref<12xf32, #tpu.memory_space<smem>>
    %21 = vector.broadcast %20 : f32 to vector<1x2xf32>
    %c10 = arith.constant 10 : index
    %22 = memref.load %arg0[%c10] : memref<12xf32, #tpu.memory_space<smem>>
    %23 = vector.broadcast %22 : f32 to vector<1x2xf32>
    %c11 = arith.constant 11 : index
    %24 = memref.load %arg0[%c11] : memref<12xf32, #tpu.memory_space<smem>>
    %25 = vector.broadcast %24 : f32 to vector<1x2xf32>
    %26 = tpu.concatenate %19, %21, %23, %25 in 0 : vector<1x2xf32>, vector<1x2xf32>, vector<1x2xf32>, vector<1x2xf32> -> vector<4x2xf32>
    %c0_0 = arith.constant 0 : index
    %c0_1 = arith.constant 0 : index
    %27 = vector.load %arg1[%c0_0, %c0_1] : memref<8x2xf32, #tpu.memory_space<vmem>>, vector<8x2xf32>
    %28 = vector.shape_cast %27 : vector<8x2xf32> to vector<8x1x2xf32>
    %29 = vector.shape_cast %8 : vector<4x2xf32> to vector<1x4x2xf32>
    %30 = vector.broadcast %28 : vector<8x1x2xf32> to vector<8x4x2xf32>
    %31 = vector.broadcast %29 : vector<1x4x2xf32> to vector<8x4x2xf32>
    %32 = arith.mulf %30, %31 : vector<8x4x2xf32>
    %33 = vector.shape_cast %26 : vector<4x2xf32> to vector<1x4x2xf32>
    %34 = vector.broadcast %33 : vector<1x4x2xf32> to vector<8x4x2xf32>
    %35 = arith.addf %32, %34 : vector<8x4x2xf32>
    %cst = arith.constant 0.000000e+00 : f32
    %36 = vector.broadcast %cst : f32 to vector<1x2xf32>
    %cst_2 = arith.constant 0.000000e+00 : f32
    %37 = vector.broadcast %cst_2 : f32 to vector<1x2xf32>
    %38 = vector.extract_strided_slice %35 {offsets = [0, 0, 0], sizes = [1, 4, 2], strides = [1, 1, 1]} : vector<8x4x2xf32> to vector<1x4x2xf32>
    %39 = vector.shape_cast %38 : vector<1x4x2xf32> to vector<4x2xf32>
    %40 = vector.broadcast %36 : vector<1x2xf32> to vector<4x2xf32>
    %41 = arith.mulf %17, %40 : vector<4x2xf32>
    %42 = arith.addf %39, %41 : vector<4x2xf32>
    %43 = math.tanh %42 : vector<4x2xf32>
    %cst_3 = arith.constant 5.000000e-01 : f32
    %44 = vector.broadcast %cst_3 : f32 to vector<4x2xf32>
    %45 = arith.mulf %44, %43 : vector<4x2xf32>
    %cst_4 = arith.constant 5.000000e-01 : f32
    %46 = vector.broadcast %cst_4 : f32 to vector<4x2xf32>
    %47 = arith.addf %45, %46 : vector<4x2xf32>
    %48 = vector.extract_strided_slice %47 {offsets = [0, 0], sizes = [1, 2], strides = [1, 1]} : vector<4x2xf32> to vector<1x2xf32>
    %49 = vector.extract_strided_slice %47 {offsets = [1, 0], sizes = [1, 2], strides = [1, 1]} : vector<4x2xf32> to vector<1x2xf32>
    %50 = vector.extract_strided_slice %43 {offsets = [2, 0], sizes = [1, 2], strides = [1, 1]} : vector<4x2xf32> to vector<1x2xf32>
    %51 = vector.extract_strided_slice %47 {offsets = [3, 0], sizes = [1, 2], strides = [1, 1]} : vector<4x2xf32> to vector<1x2xf32>
    %52 = arith.mulf %49, %37 : vector<1x2xf32>
    %53 = arith.mulf %48, %50 : vector<1x2xf32>
    %54 = arith.addf %52, %53 : vector<1x2xf32>
    %55 = math.tanh %54 : vector<1x2xf32>
    %56 = arith.mulf %51, %55 : vector<1x2xf32>
    %57 = vector.extract_strided_slice %35 {offsets = [1, 0, 0], sizes = [1, 4, 2], strides = [1, 1, 1]} : vector<8x4x2xf32> to vector<1x4x2xf32>
    %58 = vector.shape_cast %57 : vector<1x4x2xf32> to vector<4x2xf32>
    %59 = vector.broadcast %56 : vector<1x2xf32> to vector<4x2xf32>
    %60 = arith.mulf %17, %59 : vector<4x2xf32>
    %61 = arith.addf %58, %60 : vector<4x2xf32>
    %62 = math.tanh %61 : vector<4x2xf32>
    %cst_5 = arith.constant 5.000000e-01 : f32
    %63 = vector.broadcast %cst_5 : f32 to vector<4x2xf32>
    %64 = arith.mulf %63, %62 : vector<4x2xf32>
    %cst_6 = arith.constant 5.000000e-01 : f32
    %65 = vector.broadcast %cst_6 : f32 to vector<4x2xf32>
    %66 = arith.addf %64, %65 : vector<4x2xf32>
    %67 = vector.extract_strided_slice %66 {offsets = [0, 0], sizes = [1, 2], strides = [1, 1]} : vector<4x2xf32> to vector<1x2xf32>
    %68 = vector.extract_strided_slice %66 {offsets = [1, 0], sizes = [1, 2], strides = [1, 1]} : vector<4x2xf32> to vector<1x2xf32>
    %69 = vector.extract_strided_slice %62 {offsets = [2, 0], sizes = [1, 2], strides = [1, 1]} : vector<4x2xf32> to vector<1x2xf32>
    %70 = vector.extract_strided_slice %66 {offsets = [3, 0], sizes = [1, 2], strides = [1, 1]} : vector<4x2xf32> to vector<1x2xf32>
    %71 = arith.mulf %68, %54 : vector<1x2xf32>
    %72 = arith.mulf %67, %69 : vector<1x2xf32>
    %73 = arith.addf %71, %72 : vector<1x2xf32>
    %74 = math.tanh %73 : vector<1x2xf32>
    %75 = arith.mulf %70, %74 : vector<1x2xf32>
    %76 = vector.extract_strided_slice %35 {offsets = [2, 0, 0], sizes = [1, 4, 2], strides = [1, 1, 1]} : vector<8x4x2xf32> to vector<1x4x2xf32>
    %77 = vector.shape_cast %76 : vector<1x4x2xf32> to vector<4x2xf32>
    %78 = vector.broadcast %75 : vector<1x2xf32> to vector<4x2xf32>
    %79 = arith.mulf %17, %78 : vector<4x2xf32>
    %80 = arith.addf %77, %79 : vector<4x2xf32>
    %81 = math.tanh %80 : vector<4x2xf32>
    %cst_7 = arith.constant 5.000000e-01 : f32
    %82 = vector.broadcast %cst_7 : f32 to vector<4x2xf32>
    %83 = arith.mulf %82, %81 : vector<4x2xf32>
    %cst_8 = arith.constant 5.000000e-01 : f32
    %84 = vector.broadcast %cst_8 : f32 to vector<4x2xf32>
    %85 = arith.addf %83, %84 : vector<4x2xf32>
    %86 = vector.extract_strided_slice %85 {offsets = [0, 0], sizes = [1, 2], strides = [1, 1]} : vector<4x2xf32> to vector<1x2xf32>
    %87 = vector.extract_strided_slice %85 {offsets = [1, 0], sizes = [1, 2], strides = [1, 1]} : vector<4x2xf32> to vector<1x2xf32>
    %88 = vector.extract_strided_slice %81 {offsets = [2, 0], sizes = [1, 2], strides = [1, 1]} : vector<4x2xf32> to vector<1x2xf32>
    %89 = vector.extract_strided_slice %85 {offsets = [3, 0], sizes = [1, 2], strides = [1, 1]} : vector<4x2xf32> to vector<1x2xf32>
    %90 = arith.mulf %87, %73 : vector<1x2xf32>
    %91 = arith.mulf %86, %88 : vector<1x2xf32>
    %92 = arith.addf %90, %91 : vector<1x2xf32>
    %93 = math.tanh %92 : vector<1x2xf32>
    %94 = arith.mulf %89, %93 : vector<1x2xf32>
    %95 = vector.extract_strided_slice %35 {offsets = [3, 0, 0], sizes = [1, 4, 2], strides = [1, 1, 1]} : vector<8x4x2xf32> to vector<1x4x2xf32>
    %96 = vector.shape_cast %95 : vector<1x4x2xf32> to vector<4x2xf32>
    %97 = vector.broadcast %94 : vector<1x2xf32> to vector<4x2xf32>
    %98 = arith.mulf %17, %97 : vector<4x2xf32>
    %99 = arith.addf %96, %98 : vector<4x2xf32>
    %100 = math.tanh %99 : vector<4x2xf32>
    %cst_9 = arith.constant 5.000000e-01 : f32
    %101 = vector.broadcast %cst_9 : f32 to vector<4x2xf32>
    %102 = arith.mulf %101, %100 : vector<4x2xf32>
    %cst_10 = arith.constant 5.000000e-01 : f32
    %103 = vector.broadcast %cst_10 : f32 to vector<4x2xf32>
    %104 = arith.addf %102, %103 : vector<4x2xf32>
    %105 = vector.extract_strided_slice %104 {offsets = [0, 0], sizes = [1, 2], strides = [1, 1]} : vector<4x2xf32> to vector<1x2xf32>
    %106 = vector.extract_strided_slice %104 {offsets = [1, 0], sizes = [1, 2], strides = [1, 1]} : vector<4x2xf32> to vector<1x2xf32>
    %107 = vector.extract_strided_slice %100 {offsets = [2, 0], sizes = [1, 2], strides = [1, 1]} : vector<4x2xf32> to vector<1x2xf32>
    %108 = vector.extract_strided_slice %104 {offsets = [3, 0], sizes = [1, 2], strides = [1, 1]} : vector<4x2xf32> to vector<1x2xf32>
    %109 = arith.mulf %106, %92 : vector<1x2xf32>
    %110 = arith.mulf %105, %107 : vector<1x2xf32>
    %111 = arith.addf %109, %110 : vector<1x2xf32>
    %112 = math.tanh %111 : vector<1x2xf32>
    %113 = arith.mulf %108, %112 : vector<1x2xf32>
    %114 = vector.extract_strided_slice %35 {offsets = [4, 0, 0], sizes = [1, 4, 2], strides = [1, 1, 1]} : vector<8x4x2xf32> to vector<1x4x2xf32>
    %115 = vector.shape_cast %114 : vector<1x4x2xf32> to vector<4x2xf32>
    %116 = vector.broadcast %113 : vector<1x2xf32> to vector<4x2xf32>
    %117 = arith.mulf %17, %116 : vector<4x2xf32>
    %118 = arith.addf %115, %117 : vector<4x2xf32>
    %119 = math.tanh %118 : vector<4x2xf32>
    %cst_11 = arith.constant 5.000000e-01 : f32
    %120 = vector.broadcast %cst_11 : f32 to vector<4x2xf32>
    %121 = arith.mulf %120, %119 : vector<4x2xf32>
    %cst_12 = arith.constant 5.000000e-01 : f32
    %122 = vector.broadcast %cst_12 : f32 to vector<4x2xf32>
    %123 = arith.addf %121, %122 : vector<4x2xf32>
    %124 = vector.extract_strided_slice %123 {offsets = [0, 0], sizes = [1, 2], strides = [1, 1]} : vector<4x2xf32> to vector<1x2xf32>
    %125 = vector.extract_strided_slice %123 {offsets = [1, 0], sizes = [1, 2], strides = [1, 1]} : vector<4x2xf32> to vector<1x2xf32>
    %126 = vector.extract_strided_slice %119 {offsets = [2, 0], sizes = [1, 2], strides = [1, 1]} : vector<4x2xf32> to vector<1x2xf32>
    %127 = vector.extract_strided_slice %123 {offsets = [3, 0], sizes = [1, 2], strides = [1, 1]} : vector<4x2xf32> to vector<1x2xf32>
    %128 = arith.mulf %125, %111 : vector<1x2xf32>
    %129 = arith.mulf %124, %126 : vector<1x2xf32>
    %130 = arith.addf %128, %129 : vector<1x2xf32>
    %131 = math.tanh %130 : vector<1x2xf32>
    %132 = arith.mulf %127, %131 : vector<1x2xf32>
    %133 = vector.extract_strided_slice %35 {offsets = [5, 0, 0], sizes = [1, 4, 2], strides = [1, 1, 1]} : vector<8x4x2xf32> to vector<1x4x2xf32>
    %134 = vector.shape_cast %133 : vector<1x4x2xf32> to vector<4x2xf32>
    %135 = vector.broadcast %132 : vector<1x2xf32> to vector<4x2xf32>
    %136 = arith.mulf %17, %135 : vector<4x2xf32>
    %137 = arith.addf %134, %136 : vector<4x2xf32>
    %138 = math.tanh %137 : vector<4x2xf32>
    %cst_13 = arith.constant 5.000000e-01 : f32
    %139 = vector.broadcast %cst_13 : f32 to vector<4x2xf32>
    %140 = arith.mulf %139, %138 : vector<4x2xf32>
    %cst_14 = arith.constant 5.000000e-01 : f32
    %141 = vector.broadcast %cst_14 : f32 to vector<4x2xf32>
    %142 = arith.addf %140, %141 : vector<4x2xf32>
    %143 = vector.extract_strided_slice %142 {offsets = [0, 0], sizes = [1, 2], strides = [1, 1]} : vector<4x2xf32> to vector<1x2xf32>
    %144 = vector.extract_strided_slice %142 {offsets = [1, 0], sizes = [1, 2], strides = [1, 1]} : vector<4x2xf32> to vector<1x2xf32>
    %145 = vector.extract_strided_slice %138 {offsets = [2, 0], sizes = [1, 2], strides = [1, 1]} : vector<4x2xf32> to vector<1x2xf32>
    %146 = vector.extract_strided_slice %142 {offsets = [3, 0], sizes = [1, 2], strides = [1, 1]} : vector<4x2xf32> to vector<1x2xf32>
    %147 = arith.mulf %144, %130 : vector<1x2xf32>
    %148 = arith.mulf %143, %145 : vector<1x2xf32>
    %149 = arith.addf %147, %148 : vector<1x2xf32>
    %150 = math.tanh %149 : vector<1x2xf32>
    %151 = arith.mulf %146, %150 : vector<1x2xf32>
    %152 = vector.extract_strided_slice %35 {offsets = [6, 0, 0], sizes = [1, 4, 2], strides = [1, 1, 1]} : vector<8x4x2xf32> to vector<1x4x2xf32>
    %153 = vector.shape_cast %152 : vector<1x4x2xf32> to vector<4x2xf32>
    %154 = vector.broadcast %151 : vector<1x2xf32> to vector<4x2xf32>
    %155 = arith.mulf %17, %154 : vector<4x2xf32>
    %156 = arith.addf %153, %155 : vector<4x2xf32>
    %157 = math.tanh %156 : vector<4x2xf32>
    %cst_15 = arith.constant 5.000000e-01 : f32
    %158 = vector.broadcast %cst_15 : f32 to vector<4x2xf32>
    %159 = arith.mulf %158, %157 : vector<4x2xf32>
    %cst_16 = arith.constant 5.000000e-01 : f32
    %160 = vector.broadcast %cst_16 : f32 to vector<4x2xf32>
    %161 = arith.addf %159, %160 : vector<4x2xf32>
    %162 = vector.extract_strided_slice %161 {offsets = [0, 0], sizes = [1, 2], strides = [1, 1]} : vector<4x2xf32> to vector<1x2xf32>
    %163 = vector.extract_strided_slice %161 {offsets = [1, 0], sizes = [1, 2], strides = [1, 1]} : vector<4x2xf32> to vector<1x2xf32>
    %164 = vector.extract_strided_slice %157 {offsets = [2, 0], sizes = [1, 2], strides = [1, 1]} : vector<4x2xf32> to vector<1x2xf32>
    %165 = vector.extract_strided_slice %161 {offsets = [3, 0], sizes = [1, 2], strides = [1, 1]} : vector<4x2xf32> to vector<1x2xf32>
    %166 = arith.mulf %163, %149 : vector<1x2xf32>
    %167 = arith.mulf %162, %164 : vector<1x2xf32>
    %168 = arith.addf %166, %167 : vector<1x2xf32>
    %169 = math.tanh %168 : vector<1x2xf32>
    %170 = arith.mulf %165, %169 : vector<1x2xf32>
    %171 = vector.extract_strided_slice %35 {offsets = [7, 0, 0], sizes = [1, 4, 2], strides = [1, 1, 1]} : vector<8x4x2xf32> to vector<1x4x2xf32>
    %172 = vector.shape_cast %171 : vector<1x4x2xf32> to vector<4x2xf32>
    %173 = vector.broadcast %170 : vector<1x2xf32> to vector<4x2xf32>
    %174 = arith.mulf %17, %173 : vector<4x2xf32>
    %175 = arith.addf %172, %174 : vector<4x2xf32>
    %176 = math.tanh %175 : vector<4x2xf32>
    %cst_17 = arith.constant 5.000000e-01 : f32
    %177 = vector.broadcast %cst_17 : f32 to vector<4x2xf32>
    %178 = arith.mulf %177, %176 : vector<4x2xf32>
    %cst_18 = arith.constant 5.000000e-01 : f32
    %179 = vector.broadcast %cst_18 : f32 to vector<4x2xf32>
    %180 = arith.addf %178, %179 : vector<4x2xf32>
    %181 = vector.extract_strided_slice %180 {offsets = [0, 0], sizes = [1, 2], strides = [1, 1]} : vector<4x2xf32> to vector<1x2xf32>
    %182 = vector.extract_strided_slice %180 {offsets = [1, 0], sizes = [1, 2], strides = [1, 1]} : vector<4x2xf32> to vector<1x2xf32>
    %183 = vector.extract_strided_slice %176 {offsets = [2, 0], sizes = [1, 2], strides = [1, 1]} : vector<4x2xf32> to vector<1x2xf32>
    %184 = vector.extract_strided_slice %180 {offsets = [3, 0], sizes = [1, 2], strides = [1, 1]} : vector<4x2xf32> to vector<1x2xf32>
    %185 = arith.mulf %182, %168 : vector<1x2xf32>
    %186 = arith.mulf %181, %183 : vector<1x2xf32>
    %187 = arith.addf %185, %186 : vector<1x2xf32>
    %188 = math.tanh %187 : vector<1x2xf32>
    %189 = arith.mulf %184, %188 : vector<1x2xf32>
    %190 = tpu.concatenate %56, %75, %94, %113, %132, %151, %170, %189 in 0 : vector<1x2xf32>, vector<1x2xf32>, vector<1x2xf32>, vector<1x2xf32>, vector<1x2xf32>, vector<1x2xf32>, vector<1x2xf32>, vector<1x2xf32> -> vector<8x2xf32>
    %c0_19 = arith.constant 0 : index
    %c0_20 = arith.constant 0 : index
    %191 = vector.load %arg2[%c0_19, %c0_20] : memref<8x2xf32, #tpu.memory_space<vmem>>, vector<8x2xf32>
    tpu.vector_store %arg2[%c0_19, %c0_20], %190 {strides = array<i32>} : memref<8x2xf32, #tpu.memory_space<vmem>>, vector<8x2xf32>,
    return
  }
}

</mosaic_0001>

<bundles_post_ra>
// kernel: lstm_forward.1
= control target key start
LH: loop header
LB: loop body
LE: loop exit
PB: predicated region body
PF: predicated region fallthrough
CT: control target
= control target key end

     0   :  { %7 = vsyncpa [#allocation3], 0  ;;  %s536_s0 = inlined_call_operand.vmem [shape: f32[12], index: 0, kind: input, shape index: {}]   ;;  %s537_s1 = inlined_call_operand.vmem [shape: f32[8,2], index: 1, kind: input, shape index: {}]   ;;  %s538_s2 = inlined_call_operand.vmem [shape: f32[8,2], index: 2, kind: output, shape index: {}]  }
   0x1   :  { %s14_s11 = sshll.u32 %s536_s0, 4  ;;  %s15_s11 = int_to_ptr.vmem [resolvable:$true] %s14_s11 }
   0x2   :  { %s432_s12 = scalar_lea.vmem %s15_s11, 16  ;;  %p437_p1 = scmp.lt.s32.totalorder %s15_s11, %s15_s11 }
   0x3   :  { %p433_p0 = scmp.ne.s32.totalorder %s15_s11, %s432_s12  ;;  %p438_p2 = scmp.lt.s32.totalorder %s432_s12, %s432_s12 }
   0x5   :  { %p439_p3 = por %p438_p2, %p437_p1 }
   0x7   :  { %p440_p4 = pnand %p439_p3, %p433_p0 }
   0x9   :  { %443 = shalt.err (!%p440_p4)
}
   0xa   :  { %s446_s13 = smov [#allocation2]  }
   0xb   :  { %17 = dma.vmem_to_smem %s15_s11, 16, %s446_s13, [#allocation3]  }
   0xc   :  { %444 = dma.done.wait [#allocation3], 16  }
   0xd   :  { %445 = vsyncadd [#allocation3], 4294967280 }
   0xe   :  { %23 = sfence }
   0xf   :  { %s24_s14 = sld [smem:[#allocation2]]  ;;  %s386_s15 = sld [smem:[#allocation2 + $0x1]]  ;;  %v66_v0 = vlaneseq  ;;  %v447_v1 = vmov 1966171168   ;;  %vm32_vm0 = vcmask 1040384   ;;  %vm34_vm1 = vcmask 1041408  }
  0x10   :  { %s387_s16 = sld [smem:[#allocation2 + $0x2]]  ;;  %s466_s17 = sld [smem:[#allocation2 + $0x3]]  ;;  %v64_v2 = vunpack.c.l.s4 %v447_v1  ;;  %vm36_vm2 = vcmask 1042432   ;;  %v60_v9 = vld [vmem:[%s537_s1] sm:$0xff]  ;;  %vm371_vm3 = vcmask 1043456   ;;  %vm373_vm4 = vcmask 1044480  }
  0x11   :  { %s389_s0 = sld [smem:[#allocation2 + $0x4]]  ;;  %s390_s18 = sld [smem:[#allocation2 + $0x5]]  ;;  %v470_v3 = vshrl.u32 %v66_v0, 7  ;;  %v62_v14 = vcombine.high %v60_v9, %v60_v9  ;;  %vm375_vm5 = vcmask 1045504   ;;  %vm377_vm6 = vcmask 1046528  }
  0x12   :  { %s391_s19 = sld [smem:[#allocation2 + $0x6]]  ;;  %s468_s20 = sld [smem:[#allocation2 + $0x7]]  ;;  %v65_v4 = vunpack.c.0.s8 %v64_v2  ;;  %vm379_vm7 = vcmask 15360  }
  0x13   :  { %s393_s21 = sld [smem:[#allocation2 + $0x8]]  ;;  %s394_s22 = sld [smem:[#allocation2 + $0x9]]  ;;  %v113_v25 = vsub.s32 0, %v470_v3 }
  0x14   :  { %s472_s23 = sld [smem:[#allocation2 + $0xa]]  ;;  %s474_s24 = sld [smem:[#allocation2 + $0xb]]  ;;  %v68_v10 = vsub.s32 %v65_v4, %v470_v3 }
  0x15   :  { %v25_v5 = vstv %s24_s14  ;;  %v27_v6 = vstv %s386_s15 }
  0x16   :  { %v29_v7 = vstv %s387_s16  ;;  %v33_v8 = vsel %vm32_vm0, %v25_v5, %v27_v6  ;;  %v31_v11 = vstv %s466_s17  ;;  %v69_v22 = vrot.slane %v60_v9, %v68_v10 }
  0x17   :  { %v39_v12 = vstv %s389_s0  ;;  %v41_v13 = vstv %s390_s18  ;;  %v35_v15 = vsel %vm34_vm1, %v33_v8, %v29_v7  ;;  %v76_v26 = vrot.slane %v62_v14, %v68_v10 }
  0x18   :  { %v43_v16 = vstv %s391_s19  ;;  %v45_v17 = vstv %s468_s20  ;;  %v46_v18 = vsel %vm32_vm0, %v39_v12, %v41_v13  ;;  %v77_v27 = vcombine.high %v69_v22, %v69_v22 }
  0x19   :  { %v47_v19 = vsel %vm34_vm1, %v46_v18, %v43_v16  ;;  %v50_v20 = vstv %s393_s21  ;;  %v52_v21 = vstv %s394_s22  ;;  %v85_v28 = vrot.slane %v69_v22, %v68_v10 }
  0x1a   :  { %v54_v23 = vstv %s472_s23  ;;  %v57_v24 = vsel %vm32_vm0, %v50_v20, %v52_v21  ;;  %v37_v29 = vsel %vm36_vm2, %v35_v15, %v31_v11  ;;  %v491_v30 = vsel %vm36_vm2, %v47_v19, %v45_v17 }
  0x1b   :  { %v56_v31 = vstv %s474_s24  ;;  %v58_v32 = vsel %vm34_vm1, %v57_v24, %v54_v23  ;;  %v78_v33 = vcombine.high %v76_v26, %v76_v26  ;;  %v92_v34 = vrot.slane %v76_v26, %v68_v10 }
  0x1c   :  { %v99_v35 = vrot.slane %v77_v27, %v68_v10  ;;  %v107_v36 = vcombine.high %v85_v28, %v85_v28  ;;  %v114_v37 = vrot.slane %v85_v28, %v113_v25  ;;  %v59_v38 = vsel %vm36_vm2, %v58_v32, %v56_v31 }
  0x1d   :  { %v106_v39 = vrot.slane %v78_v33, %v68_v10  ;;  %v108_v40 = vcombine.high %v92_v34, %v92_v34  ;;  %v130_v43 = vrot.slane %v92_v34, %v113_v25  ;;  %v167_v45 = vmul.f32 0.0, %v491_v30 }
  0x1e   :  { %v109_v41 = vcombine.high %v99_v35, %v99_v35  ;;  %v122_v42 = vrot.slane %v107_v36, %v113_v25  ;;  %v151_v44 = vmul.f32 %v114_v37, %v37_v29  ;;  %v118_v10 = vrot.slane %v99_v35, %v113_v25 }
  0x1f   :  { %v110_v46 = vcombine.high %v106_v39, %v106_v39  ;;  %v134_v48 = vrot.slane %v106_v39, %v113_v25  ;;  %v138_v49 = vrot.slane %v108_v40, %v113_v25  ;;  %v155_v51 = vmul.f32 %v130_v43, %v37_v29 }
  0x20   :  { %v126_v47 = vrot.slane %v109_v41, %v113_v25  ;;  %v153_v50 = vmul.f32 %v122_v42, %v37_v29  ;;  %v159_v52 = vadd.f32 %v151_v44, %v59_v38  ;;  %v152_v12 = vmul.f32 %v118_v10, %v37_v29 }
  0x21   :  { %v142_v53 = vrot.slane %v110_v46, %v113_v25  ;;  %v156_v55 = vmul.f32 %v134_v48, %v37_v29  ;;  %v157_v56 = vmul.f32 %v138_v49, %v37_v29  ;;  %v497_v58 = vadd.f32 %v155_v51, %v59_v38 }
  0x22   :  { %v154_v54 = vmul.f32 %v126_v47, %v37_v29  ;;  %v161_v57 = vadd.f32 %v153_v50, %v59_v38  ;;  %v168_v59 = vadd.f32 %v167_v45, %v159_v52  ;;  %v506_v14 = vsub.s32 3, %v470_v3 }
  0x23   :  { %v158_v60 = vmul.f32 %v142_v53, %v37_v29  ;;  %v499_v62 = vadd.f32 %v156_v55, %v59_v38  ;;  %v501_v63 = vadd.f32 %v157_v56, %v59_v38  ;;  %v160_v16 = vadd.f32 %v152_v12, %v59_v38 }
  0x24   :  { %v162_v61 = vadd.f32 %v154_v54, %v59_v38  ;;  %400 = vtanh.f32 %v168_v59 }
  0x25   :  { %v503_v0 = vadd.f32 %v158_v60, %v59_v38 }
  0x2e   :  { %v401_v1 = vpop.eup %400 }
  0x2f   :  { %v170_v2 = vmul.f32 0.5, %v401_v1  ;;  %v174_v4 = vrot.slane %v401_v1, 2 }
  0x31   :  { %v171_v5 = vadd.f32 0.5, %v170_v2 }
  0x33   :  { %v172_v6 = vmul.f32 0.0, %v171_v5  ;;  %v176_v7 = vmul.f32 %v174_v4, %v171_v5 }
  0x35   :  { %v178_v8 = vrot.slane %v176_v7, 7 }
  0x37   :  { %v180_v9 = vadd.f32 %v178_v8, %v172_v6 }
  0x39   :  { %402 = vtanh.f32 %v180_v9 }
  0x43   :  { %v403_v11 = vpop.eup %402 }
  0x44   :  { %v183_v13 = vrot.slane %v403_v11, 6 }
  0x46   :  { %v508_v15 = vmul.f32 %v183_v13, %v171_v5 }
  0x48   :  { %v189_v17 = vrot.slane %v508_v15, %v506_v14  ;;  %v348_v11 = vrot.slane %v508_v15, 3 }
  0x4a   :  { %v190_v18 = vmul.f32 %v189_v17, %v491_v30 }
  0x4c   :  { %v191_v19 = vadd.f32 %v190_v18, %v160_v16 }
  0x4e   :  { %404 = vtanh.f32 %v191_v19 }
  0x58   :  { %v405_v20 = vpop.eup %404 }
  0x59   :  { %v193_v21 = vmul.f32 0.5, %v405_v20  ;;  %v197_v22 = vrot.slane %v405_v20, 2 }
  0x5b   :  { %v194_v23 = vadd.f32 0.5, %v193_v21 }
  0x5d   :  { %v195_v24 = vmul.f32 %v194_v23, %v180_v9  ;;  %v199_v25 = vmul.f32 %v197_v22, %v194_v23 }
  0x5f   :  { %v201_v26 = vrot.slane %v199_v25, 7 }
  0x61   :  { %v203_v27 = vadd.f32 %v201_v26, %v195_v24 }
  0x63   :  { %406 = vtanh.f32 %v203_v27 }
  0x6d   :  { %v407_v3 = vpop.eup %406 }
  0x6e   :  { %v206_v28 = vrot.slane %v407_v3, 6 }
  0x70   :  { %v208_v29 = vmul.f32 %v206_v28, %v194_v23 }
  0x72   :  { %v212_v31 = vrot.slane %v208_v29, %v506_v14  ;;  %v351_v12 = vrot.slane %v208_v29, 2 }
  0x74   :  { %v213_v32 = vmul.f32 %v212_v31, %v491_v30  ;;  %v368_v16 = vsel %vm32_vm0, %v348_v11, %v351_v12 }
  0x76   :  { %v214_v33 = vadd.f32 %v213_v32, %v161_v57 }
  0x78   :  { %408 = vtanh.f32 %v214_v33 }
  0x82   :  { %v409_v34 = vpop.eup %408 }
  0x83   :  { %v216_v35 = vmul.f32 0.5, %v409_v34  ;;  %v220_v36 = vrot.slane %v409_v34, 2 }
  0x85   :  { %v217_v37 = vadd.f32 0.5, %v216_v35 }
  0x87   :  { %v218_v38 = vmul.f32 %v217_v37, %v203_v27  ;;  %v222_v39 = vmul.f32 %v220_v36, %v217_v37 }
  0x89   :  { %v224_v40 = vrot.slane %v222_v39, 7 }
  0x8b   :  { %v226_v41 = vadd.f32 %v224_v40, %v218_v38 }
  0x8d   :  { %410 = vtanh.f32 %v226_v41 }
  0x97   :  { %v411_v42 = vpop.eup %410 }
  0x98   :  { %v229_v43 = vrot.slane %v411_v42, 6 }
  0x9a   :  { %v231_v44 = vmul.f32 %v229_v43, %v217_v37 }
  0x9c   :  { %v235_v45 = vrot.slane %v231_v44, %v506_v14  ;;  %v354_v13 = vrot.slane %v231_v44, 1 }
  0x9e   :  { %v236_v46 = vmul.f32 %v235_v45, %v491_v30 }
  0xa0   :  { %v237_v47 = vadd.f32 %v236_v46, %v162_v61 }
  0xa2   :  { %412 = vtanh.f32 %v237_v47 }
  0xac   :  { %v413_v48 = vpop.eup %412 }
  0xad   :  { %v239_v49 = vmul.f32 0.5, %v413_v48  ;;  %v243_v50 = vrot.slane %v413_v48, 2 }
  0xaf   :  { %v240_v51 = vadd.f32 0.5, %v239_v49 }
  0xb1   :  { %v241_v52 = vmul.f32 %v240_v51, %v226_v41  ;;  %v245_v53 = vmul.f32 %v243_v50, %v240_v51 }
  0xb3   :  { %v247_v54 = vrot.slane %v245_v53, 7 }
  0xb5   :  { %v249_v55 = vadd.f32 %v247_v54, %v241_v52 }
  0xb7   :  { %414 = vtanh.f32 %v249_v55 }
  0xc1   :  { %v415_v56 = vpop.eup %414 }
  0xc2   :  { %v252_v57 = vrot.slane %v415_v56, 6 }
  0xc4   :  { %v254_v59 = vmul.f32 %v252_v57, %v240_v51 }
  0xc6   :  { %v258_v60 = vrot.slane %v254_v59, %v506_v14 }
  0xc8   :  { %v259_v1 = vmul.f32 %v258_v60, %v491_v30 }
  0xca   :  { %v260_v2 = vadd.f32 %v259_v1, %v497_v58  ;;  %v369_v58 = vsel %vm34_vm1, %v368_v16, %v354_v13 }
  0xcb   :  { %v370_v20 = vsel %vm36_vm2, %v369_v58, %v254_v59 }
  0xcc   :  { %416 = vtanh.f32 %v260_v2 }
  0xd6   :  { %v417_v61 = vpop.eup %416 }
  0xd7   :  { %v262_v4 = vmul.f32 0.5, %v417_v61  ;;  %v266_v5 = vrot.slane %v417_v61, 2 }
  0xd9   :  { %v263_v6 = vadd.f32 0.5, %v262_v4 }
  0xdb   :  { %v264_v7 = vmul.f32 %v263_v6, %v249_v55  ;;  %v268_v8 = vmul.f32 %v266_v5, %v263_v6 }
  0xdd   :  { %v270_v9 = vrot.slane %v268_v8, 7 }
  0xdf   :  { %v272_v10 = vadd.f32 %v270_v9, %v264_v7 }
  0xe1   :  { %418 = vtanh.f32 %v272_v10 }
  0xeb   :  { %v419_v17 = vpop.eup %418 }
  0xec   :  { %v275_v18 = vrot.slane %v419_v17, 6 }
  0xee   :  { %v277_v19 = vmul.f32 %v275_v18, %v263_v6 }
  0xf0   :  { %v281_v21 = vrot.slane %v277_v19, %v506_v14  ;;  %v357_v22 = vrot.slane %v277_v19, 7 }
  0xf2   :  { %v282_v23 = vmul.f32 %v281_v21, %v491_v30  ;;  %v372_v24 = vsel %vm371_vm3, %v370_v20, %v357_v22 }
  0xf4   :  { %v283_v15 = vadd.f32 %v282_v23, %v499_v62 }
  0xf6   :  { %420 = vtanh.f32 %v283_v15 }
 0x100   :  { %v421_v25 = vpop.eup %420 }
 0x101   :  { %v285_v26 = vmul.f32 0.5, %v421_v25  ;;  %v289_v27 = vrot.slane %v421_v25, 2 }
 0x103   :  { %v286_v3 = vadd.f32 0.5, %v285_v26 }
 0x105   :  { %v287_v28 = vmul.f32 %v286_v3, %v272_v10  ;;  %v291_v29 = vmul.f32 %v289_v27, %v286_v3 }
 0x107   :  { %v293_v31 = vrot.slane %v291_v29, 7 }
 0x109   :  { %v295_v32 = vadd.f32 %v293_v31, %v287_v28 }
 0x10b   :  { %422 = vtanh.f32 %v295_v32 }
 0x115   :  { %v423_v33 = vpop.eup %422 }
 0x116   :  { %v298_v34 = vrot.slane %v423_v33, 6 }
 0x118   :  { %v300_v35 = vmul.f32 %v298_v34, %v286_v3 }
 0x11a   :  { %v304_v36 = vrot.slane %v300_v35, %v506_v14  ;;  %v360_v37 = vrot.slane %v300_v35, 6 }
 0x11c   :  { %v305_v38 = vmul.f32 %v304_v36, %v491_v30  ;;  %v374_v62 = vsel %vm373_vm4, %v372_v24, %v360_v37 }
 0x11e   :  { %v306_v39 = vadd.f32 %v305_v38, %v501_v63 }
 0x120   :  { %424 = vtanh.f32 %v306_v39 }
 0x12a   :  { %v425_v40 = vpop.eup %424 }
 0x12b   :  { %v308_v41 = vmul.f32 0.5, %v425_v40  ;;  %v312_v42 = vrot.slane %v425_v40, 2 }
 0x12d   :  { %v309_v43 = vadd.f32 0.5, %v308_v41 }
 0x12f   :  { %v310_v44 = vmul.f32 %v309_v43, %v295_v32  ;;  %v314_v45 = vmul.f32 %v312_v42, %v309_v43 }
 0x131   :  { %v316_v46 = vrot.slane %v314_v45, 7 }
 0x133   :  { %v318_v47 = vadd.f32 %v316_v46, %v310_v44 }
 0x135   :  { %426 = vtanh.f32 %v318_v47 }
 0x13f   :  { %v427_v48 = vpop.eup %426 }
 0x140   :  { %v321_v49 = vrot.slane %v427_v48, 6 }
 0x142   :  { %v323_v50 = vmul.f32 %v321_v49, %v309_v43 }
 0x144   :  { %v327_v51 = vrot.slane %v323_v50, %v506_v14  ;;  %v363_v52 = vrot.slane %v323_v50, 5 }
 0x146   :  { %v328_v53 = vmul.f32 %v327_v51, %v491_v30  ;;  %v376_v63 = vsel %vm375_vm5, %v374_v62, %v363_v52 }
 0x148   :  { %v329_v54 = vadd.f32 %v328_v53, %v503_v0 }
 0x14a   :  { %428 = vtanh.f32 %v329_v54 }
 0x154   :  { %v429_v55 = vpop.eup %428 }
 0x155   :  { %v331_v56 = vmul.f32 0.5, %v429_v55  ;;  %v335_v57 = vrot.slane %v429_v55, 2 }
 0x157   :  { %v332_v59 = vadd.f32 0.5, %v331_v56 }
 0x159   :  { %v333_v60 = vmul.f32 %v332_v59, %v318_v47  ;;  %v337_v1 = vmul.f32 %v335_v57, %v332_v59 }
 0x15b   :  { %v339_v2 = vrot.slane %v337_v1, 7 }
 0x15d   :  { %v341_v61 = vadd.f32 %v339_v2, %v333_v60 }
 0x15f   :  { %430 = vtanh.f32 %v341_v61 }
 0x169   :  { %v431_v4 = vpop.eup %430 }
 0x16a   :  { %v344_v5 = vrot.slane %v431_v4, 6 }
 0x16c   :  { %v346_v6 = vmul.f32 %v344_v5, %v332_v59 }
 0x16e   :  { %v366_v14 = vrot.slane %v346_v6, 4 }
 0x170   :  { %v378_v30 = vsel %vm377_vm6, %v376_v63, %v366_v14 }
 0x171   :  { %380 = vst.msk [vmem:[%s538_s2] sm:$0xff] %vm379_vm7, %v378_v30 }
 0x172   :  { %385 = vsyncpa [#allocation3], 1 }

</bundles_post_ra>
